<compile_context>
chip_gen: v7x
topology: tpu7x:2x2x1
jax: 0.10.0
libtpu: 0.0.40
codegen_flags: <defaults>
</compile_context>

<pallas_src>
import functools

import jax
import jax.numpy as jnp
from jax.experimental import pallas as pl
from jax.experimental.pallas import tpu as pltpu

M_PLUS = 0.9
M_MINUS = 0.1
LAMBDA_SYM = 0.5

_MAX_TILE_ROWS = 8192            # 8192 rows * 128 lanes * 4 B = 4 MiB per input buffer (f32);
                                 # x2 double-buffering = 8 MiB -> safe on v5e/v6e/v7x defaults.
_SMALL_FALLBACK_ELEMS = 1 << 15  # below this, a fused XLA expression beats a kernel launch.


def _dense_sum_kernel(x_ref, out_ref, *, tb, total_rows):
    """Accumulate sum(relu(x - m_minus)^2) into a resident (1, W) output tile.

    x_ref   : [TB, W] activations (any float dtype), cast to f32 in-kernel.
    out_ref : [1, W] f32 accumulator, same block for every grid step.
    """
    @pl.when(pl.program_id(0) == 0)
    def _init():
        out_ref[...] = jnp.zeros_like(out_ref)

    x = x_ref[...].astype(jnp.float32)
    neg = jnp.maximum(x - M_MINUS, 0.0)
    d = neg * neg

    if total_rows % tb != 0:
        # Only compiled when the last block is partial: mask padded rows (select,
        # so garbage / NaN in the unspecified padded region never propagates).
        row = pl.program_id(0) * tb + jax.lax.broadcasted_iota(jnp.int32, d.shape, 0)
        d = jnp.where(row < total_rows, d, 0.0)

    out_ref[...] += jnp.sum(d, axis=0, keepdims=True)


def _choose_tile(rows, max_tile_rows):
    if rows <= max_tile_rows:
        return rows, 1                      # single block; block == full dim is always legal
    tb = max((max_tile_rows // 8) * 8, 8)   # multiple of 8 sublanes
    return tb, pl.cdiv(rows, tb)


def _pallas_dense_sum(view, rows, width, max_tile_rows):
    """sum(relu(view - m_minus)^2) over a [rows, width] array via Pallas."""
    tb, num_blocks = _choose_tile(rows, max_tile_rows)
    kernel = functools.partial(_dense_sum_kernel, tb=tb, total_rows=rows)
    out = pl.pallas_call(
        kernel,
        out_shape=jax.ShapeDtypeStruct((1, width), jnp.float32),
        grid=(num_blocks,),
        in_specs=[pl.BlockSpec((tb, width), lambda i: (i, 0))],
        out_specs=pl.BlockSpec((1, width), lambda i: (0, 0)),   # resident accumulator
        compiler_params=pltpu.CompilerParams(
            dimension_semantics=("arbitrary",),
        ),
    )(view)
    return jnp.sum(out)   # tiny (<=128-elem) reduce, fused with the wrapper correction term


def margin_loss(result, targets, average=True, *,
                max_tile_rows=_MAX_TILE_ROWS,
                min_pallas_elems=_SMALL_FALLBACK_ELEMS):
    """result: [B, C] float (f32/bf16), targets: [B] int class indices."""
    B, C = result.shape
    n = B * C

    # Per-row target correction: tiny [B] gather + elementwise, done in XLA.
    tgt = targets.reshape(B, 1).astype(jnp.int32)
    x_t = jnp.take_along_axis(result, tgt, axis=1).astype(jnp.float32)     # [B, 1]
    pos_t = jnp.maximum(M_PLUS - x_t, 0.0)
    neg_t = jnp.maximum(x_t - M_MINUS, 0.0)
    corr = jnp.sum(pos_t * pos_t - LAMBDA_SYM * (neg_t * neg_t))

    if n < min_pallas_elems:
        # Small-problem fast path: fused XLA is cheaper than a pallas_call launch.
        xf = result.astype(jnp.float32)
        negf = jnp.maximum(xf - M_MINUS, 0.0)
        dense = jnp.sum(negf * negf)
    elif n % 128 == 0:
        # Lane-dense path: free row-major reshape to [n/128, 128].
        rows = n // 128
        dense = _pallas_dense_sum(result.reshape(rows, 128), rows, 128, max_tile_rows)
    else:
        # Fallback: keep the [B, C] layout (lane-padded tiles) when n % 128 != 0.
        dense = _pallas_dense_sum(result, B, C, max_tile_rows)

    total = LAMBDA_SYM * dense + corr
    if average:
        total = total / float(n)
    return total


def _reference(result, targets, average=True):
    result = result.astype(jnp.float32)
    _, C = result.shape
    t = jax.nn.one_hot(targets, C, dtype=jnp.float32)
    pos = jnp.maximum(M_PLUS - result, 0.0)
    neg = jnp.maximum(result - M_MINUS, 0.0)
    losses = t * pos**2 + LAMBDA_SYM * (1.0 - t) * neg**2
    return jnp.mean(losses) if average else jnp.sum(losses)


if __name__ == "__main__":
    key = jax.random.PRNGKey(0)
    k1, k2, k3, k4 = jax.random.split(key, 4)

    # Primary capsule-net case: batch=8, num_classes=10. Force the Pallas path
    # (min_pallas_elems=0) so the kernel itself is exercised.
    B, C = 8, 10
    result = jax.random.uniform(k1, (B, C), dtype=jnp.float32)   # capsule lengths in [0,1]
    targets = jax.random.randint(k2, (B,), 0, C, dtype=jnp.int32)

    out = margin_loss(result, targets, average=True, min_pallas_elems=0)
    jax.block_until_ready(out)
    ref = _reference(result, targets, average=True)
    assert jnp.allclose(out, ref, rtol=1e-5, atol=1e-6), (out, ref)

    out_sum = margin_loss(result, targets, average=False, min_pallas_elems=0)
    jax.block_until_ready(out_sum)
    ref_sum = _reference(result, targets, average=False)
    assert jnp.allclose(out_sum, ref_sum, rtol=1e-5, atol=1e-5), (out_sum, ref_sum)

    # Lane-dense multi-block path: B*C % 128 == 0 -> [20, 128] view, tb=8 -> 3 grid
    # steps with a partial last block (tail masking), bf16 input cast in-kernel.
    B2 = 256
    result2 = jax.random.uniform(k3, (B2, C), dtype=jnp.float32).astype(jnp.bfloat16)
    targets2 = jax.random.randint(k4, (B2,), 0, C, dtype=jnp.int32)
    out2 = margin_loss(result2, targets2, average=True,
                       max_tile_rows=8, min_pallas_elems=0)
    jax.block_until_ready(out2)
    ref2 = _reference(result2, targets2, average=True)
    assert jnp.allclose(out2, ref2, rtol=2e-3, atol=1e-4), (out2, ref2)

    # Small-problem fast path (pure XLA) matches too.
    out3 = margin_loss(result, targets, average=True)
    jax.block_until_ready(out3)
    assert jnp.allclose(out3, ref, rtol=1e-5, atol=1e-6), (out3, ref)

    print("KERNEL_OK")
</pallas_src>

<mosaic_0001>
module attributes {stable_mosaic.version = 11 : i64} {
  func.func @_dense_sum_kernel(%arg0: i32, %arg1: memref<8x10xf32, #tpu.memory_space<vmem>>, %arg2: memref<1x10xf32, #tpu.memory_space<vmem>>) attributes {dimension_semantics = [#tpu.dimension_semantics<arbitrary>], iteration_bounds = array<i64: 1>, scalar_prefetch = 0 : i64, scratch_operands = 0 : i64, tpu.core_type = #tpu.core_type<tc>, window_params = [{transform_indices = @transform_0, window_bounds = array<i64: 8, 10>}, {pipeline_mode = #tpu.pipeline_mode<synchronous>, transform_indices = @transform_1, window_bounds = array<i64: 1, 10>}]} {
    %c0_i32 = arith.constant 0 : i32
    %0 = arith.cmpi eq, %arg0, %c0_i32 : i32
    %1 = arith.extui %0 : i1 to i32
    %c0_i32_0 = arith.constant 0 : i32
    %2 = arith.cmpi ne, %1, %c0_i32_0 : i32
    scf.if %2 {
      %cst_8 = arith.constant 0.000000e+00 : f32
      %14 = vector.broadcast %cst_8 : f32 to vector<1x10xf32>
      %c0_9 = arith.constant 0 : index
      %c0_10 = arith.constant 0 : index
      %15 = vector.load %arg2[%c0_9, %c0_10] : memref<1x10xf32, #tpu.memory_space<vmem>>, vector<1x10xf32>
      tpu.vector_store %arg2[%c0_9, %c0_10], %14 {strides = array<i32>} : memref<1x10xf32, #tpu.memory_space<vmem>>, vector<1x10xf32>,
    } else {
    }
    %c0 = arith.constant 0 : index
    %c0_1 = arith.constant 0 : index
    %3 = vector.load %arg1[%c0, %c0_1] : memref<8x10xf32, #tpu.memory_space<vmem>>, vector<8x10xf32>
    %cst = arith.constant 1.000000e-01 : f32
    %4 = vector.broadcast %cst : f32 to vector<8x10xf32>
    %5 = arith.subf %3, %4 : vector<8x10xf32>
    %cst_2 = arith.constant 0.000000e+00 : f32
    %6 = vector.broadcast %cst_2 : f32 to vector<8x10xf32>
    %7 = arith.maximumf %5, %6 : vector<8x10xf32>
    %8 = arith.mulf %7, %7 : vector<8x10xf32>
    %c0_3 = arith.constant 0 : index
    %c0_4 = arith.constant 0 : index
    %9 = vector.load %arg2[%c0_3, %c0_4] : memref<1x10xf32, #tpu.memory_space<vmem>>, vector<1x10xf32>
    %cst_5 = arith.constant dense<0.000000e+00> : vector<10xf32>
    %10 = vector.multi_reduction <add>, %8, %cst_5 [0] : vector<8x10xf32> to vector<10xf32>
    %11 = vector.shape_cast %10 : vector<10xf32> to vector<1x10xf32>
    %12 = arith.addf %9, %11 : vector<1x10xf32>
    %c0_6 = arith.constant 0 : index
    %c0_7 = arith.constant 0 : index
    %13 = vector.load %arg2[%c0_6, %c0_7] : memref<1x10xf32, #tpu.memory_space<vmem>>, vector<1x10xf32>
    tpu.vector_store %arg2[%c0_6, %c0_7], %12 {strides = array<i32>} : memref<1x10xf32, #tpu.memory_space<vmem>>, vector<1x10xf32>,
    return
  }
  func.func @transform_0(%arg0: i32) -> (i32, i32) {
    %c0_i32 = arith.constant 0 : i32
    %c0_i32_0 = arith.constant 0 : i32
    return %arg0, %c0_i32 : i32, i32
  }
  func.func @transform_1(%arg0: i32) -> (i32, i32) {
    %c0_i32 = arith.constant 0 : i32
    %c0_i32_0 = arith.constant 0 : i32
    %c0_i32_1 = arith.constant 0 : i32
    return %c0_i32, %c0_i32_0 : i32, i32
  }
}

</mosaic_0001>

<bundles_post_ra>
// kernel: tpu_custom_call.1
= control target key start
LH: loop header
LB: loop body
LE: loop exit
PB: predicated region body
PF: predicated region fallthrough
CT: control target
= control target key end

     0   :  { %6 = vsyncpa [#allocation3], 0  ;;  %s149_s0 = inlined_call_operand.hbm [shape: f32[8,10], index: 0, kind: input, shape index: {}]   ;;  %s150_s1 = inlined_call_operand.hbm [shape: f32[1,10], index: 1, kind: output, shape index: {}]  }
   0x1   :  { %7 = vsyncpa [#allocation4], 0  ;;  %s110_s6 = smov [#allocation2]   ;;  %s62_s10 = scalar_lea.hbm %s149_s0, 128 }
   0x2   :  { %s14_s7 = sshll.u32 %s110_s6, 4  ;;  %p63_p0 = scmp.ne.s32.totalorder %s149_s0, %s62_s10  ;;  %s15_s7 = int_to_ptr.vmem [resolvable:$true] %s14_s7 }
   0x3   :  { %p66_p1 = scmp.lt.u32.totalorder %s62_s10, %s149_s0 }
   0x5   :  { %p68_p2 = pnand %p66_p1, %p63_p0 }
   0x7   :  { %71 = shalt.err (!%p68_p2)
}
   0x8   :  { %s72_s15 = scalar_lea.vmem %s15_s7, 128  ;;  %p77_p4 = scmp.lt.s32.totalorder %s15_s7, %s15_s7 }
   0x9   :  { %p73_p3 = scmp.ne.s32.totalorder %s15_s7, %s72_s15  ;;  %p78_p5 = scmp.lt.s32.totalorder %s72_s15, %s72_s15 }
   0xb   :  { %p79_p6 = por %p78_p5, %p77_p4 }
   0xd   :  { %p80_p7 = pnand %p79_p6, %p73_p3 }
   0xf   :  { %83 = shalt.err (!%p80_p7)
}
  0x10   :  { %17 = dma.hbm_to_vmem [thread:$0]  %s149_s0, 128, %s15_s7, [#allocation3]  }
  0x11   :  { %106 = dma.done.wait [#allocation3], 128  }
  0x12   :  { %107 = vsyncadd [#allocation3], 4294967168  ;;  %vm25_vm0 = vcmask 73728   ;;  %v111_v0 = vmov 0.0   ;;  %v27_v1 = vld [vmem:[#allocation2] sm:$0xff]  ;;  %vm32_vm1 = vcmask 80896  }
  0x13   :  { %26 = vst.msk [vmem:[#allocation5] sm:$0x1] %vm25_vm0, %v111_v0  ;;  %v58_v2 = vadd.f32 -0.1, %v27_v1  ;;  %s112_s18 = smov [#allocation5]  }
  0x14   :  { %s49_s0 = sshll.u32 %s112_s18, 4  ;;  %s50_s0 = int_to_ptr.vmem [resolvable:$true] %s49_s0 }
  0x15   :  { %v29_v3 = vmax.f32 %v58_v2, 0.0  ;;  %s84_s19 = scalar_lea.vmem %s50_s0, 16  ;;  %s88_s20 = scalar_lea.vmem %s50_s0, 32 }
  0x16   :  { %p85_p8 = scmp.ne.s32.totalorder %s50_s0, %s84_s19  ;;  %p89_p9 = scmp.lt.s32.totalorder %s50_s0, %s50_s0 }
  0x17   :  { %v30_v4 = vmul.f32 %v29_v3, %v29_v3  ;;  %p90_p10 = scmp.lt.s32.totalorder %s88_s20, %s84_s19 }
  0x19   :  { %v33_v5 = vsel %vm32_vm1, %v30_v4, 0.0  ;;  %p91_p11 = por %p90_p10, %p89_p9 }
  0x1a   :  { %v34_v6 = vrot.slane %v33_v5, 4  ;;  %v31_v11 = vld [vmem:[#allocation5] sm:$0x1] }
  0x1b   :  { %p92_p12 = pnand %p91_p11, %p85_p8 }
  0x1c   :  { %v35_v7 = vadd.f32 %v34_v6, %v33_v5 }
  0x1e   :  { %v36_v8 = vrot.slane %v35_v7, 2 }
  0x20   :  { %v37_v9 = vadd.f32 %v36_v8, %v35_v7 }
  0x22   :  { %v38_v10 = vrot.slane %v37_v9, 1 }
  0x24   :  { %v39_v12 = vadd.f32 %v38_v10, %v37_v9 }
  0x26   :  { %v40_v13 = vadd.f32 %v39_v12, %v31_v11 }
  0x28   :  { %42 = vst.msk [vmem:[#allocation5] sm:$0x1] %vm25_vm0, %v40_v13 }
  0x29   :  { %95 = shalt.err (!%p92_p12)
}
  0x2a   :  { %s96_s23 = scalar_lea.hbm %s150_s1, 16 }
  0x2b   :  { %p97_p13 = scmp.ne.s32.totalorder %s150_s1, %s96_s23  ;;  %p100_p0 = scmp.lt.u32.totalorder %s96_s23, %s150_s1 }
  0x2d   :  { %p102_p1 = pnand %p100_p0, %p97_p13 }
  0x2f   :  { %105 = shalt.err (!%p102_p1)
}
  0x30   :  { %52 = dma.vmem_to_hbm [thread:$0]  %s50_s0, 16, %s150_s1, [#allocation4]  }
  0x31   :  { %108 = dma.done.wait [#allocation4], 16  }
  0x32   :  { %109 = vsyncadd [#allocation4], 4294967280 }
  0x33   :  { %56 = vsyncpa [#allocation3], 1 }
  0x34   :  { %57 = vsyncpa [#allocation4], 1 }

</bundles_post_ra>
